<compile_context>
chip_gen: v6e
topology: v6e:2x2x1
jax: 0.10.0
libtpu: 0.0.40
codegen_flags: <defaults>
</compile_context>

<pallas_src>
import functools
import math

import jax
import jax.numpy as jnp
import numpy as np
from jax.experimental import pallas as pl
from jax.experimental.pallas import tpu as pltpu


_PAD_MODE = {
    "zeros": "constant",
    "constant": "constant",
    "reflect": "reflect",
    "replicate": "edge",
    "circular": "wrap",
}


def _cdiv(a, b):
    return -(-a // b)


def _round_up(a, b):
    return _cdiv(a, b) * b


# ----------------------------------------------------------------------------
# Mask construction (mirrors BodyPartConv.__init__, numpy glue)
# ----------------------------------------------------------------------------
def build_mask(body_lens, masks, in_channels, out_channels, kernel_size,
               joint_num, first_layer=False, last_layer=False):
    in_per_part = in_channels // body_lens
    out_per_part = out_channels // body_lens

    in_neighbour_list = []
    if not first_layer:
        for i in range(body_lens):
            in_neighbour_list.append(
                list(range(i * in_per_part, (i + 1) * in_per_part)))
    else:
        per_joint = in_channels // joint_num
        for i in range(masks.shape[0]):
            idx = list(np.where(masks[i] == 1)[0])
            expanded = []
            for k in idx:
                for j in range(per_joint):
                    expanded.append(int(k) * per_joint + j)
            in_neighbour_list.append(expanded)

    out_neighbour_list = []
    if not last_layer:
        for i in range(body_lens):
            out_neighbour_list.append(
                list(range(i * out_per_part, (i + 1) * out_per_part)))
    else:
        per_joint = out_channels // joint_num
        for i in range(body_lens):
            idx = list(np.where(masks[i] == 1)[0])
            expanded = []
            for k in idx:
                for j in range(per_joint):
                    expanded.append(int(k) * per_joint + j)
            out_neighbour_list.append(expanded)

    mask = np.zeros((out_channels, in_channels, kernel_size), dtype=np.float32)
    for i in range(body_lens):
        for j in out_neighbour_list[i]:
            mask[j, in_neighbour_list[i], :] = 1.0

    if last_layer:
        def check_inpart(i):
            return any(i in out_list for out_list in out_neighbour_list)
        for k in range(out_channels):
            if not check_inpart(k):
                mask[k, ...] = 1.0
    return mask


# ----------------------------------------------------------------------------
# Pallas kernel: one batch block = K accumulating matmuls over shifted views
# ----------------------------------------------------------------------------
def _bodypart_conv_kernel(x_ref, w_ref, b_ref, o_ref, *, kernel_size, w_out):
    # x_ref : (1, C_in, W_in)    lane-dense padded input block (bt batch
    #                            elements concatenated along the lane axis)
    # w_ref : (K, C_out, C_in)   pre-masked weights, tap-major
    # b_ref : (C_out, 1)         bias column (zeros when bias is None)
    # o_ref : (1, C_out, W_out)  lane-dense output block (W_out % 128 == 0)
    acc = jnp.dot(w_ref[0], x_ref[0, :, 0:w_out],
                  preferred_element_type=jnp.float32)
    for kk in range(1, kernel_size):
        acc += jnp.dot(w_ref[kk], x_ref[0, :, kk:kk + w_out],
                       preferred_element_type=jnp.float32)
    o_ref[0] = (acc + b_ref[...]).astype(o_ref.dtype)


# ----------------------------------------------------------------------------
# Wrapper (padding, layout plumbing, block sizing, pallas_call)
# ----------------------------------------------------------------------------
def bodypart_conv(x, weight, mask, bias=None, *, stride=1, padding=0,
                  padding_mode="constant", compute_dtype=None):
    n, c_in, l = x.shape
    c_out, c_in_w, k = weight.shape
    assert c_in_w == c_in
    l_pad = l + 2 * padding
    l_out = (l_pad - k) // stride + 1
    assert l_out >= 1

    mode = _PAD_MODE.get(padding_mode, padding_mode)
    if padding > 0:
        x_p = jnp.pad(x, ((0, 0), (0, 0), (padding, padding)), mode=mode)
    else:
        x_p = x

    # ---- block sizing: lane width ~512-2048 when the batch allows, at least
    #      two blocks for a 2-TensorCore chip if that keeps >=256 lanes,
    #      under a conservative per-block VMEM budget (double buffering).
    esize = 2 if compute_dtype == jnp.bfloat16 else 4

    def _block_bytes(bt_):
        w_out_ = _round_up(bt_ * l_pad, 128)
        w_in_ = _round_up(w_out_ + k - 1, 128)
        return (2 * w_in_ * c_in * esize                 # double-buffered input
                + 2 * w_out_ * c_out * x.dtype.itemsize  # double-buffered output
                + w_out_ * c_out * 4                     # f32 accumulator vregs
                + 2 * k * c_out * c_in * esize           # weights
                + 2 * c_out * 128 * 4)                   # bias column (padded)

    bt = max(1, min(n, 1024 // max(1, l_pad)))
    if bt >= n and n >= 2 and _cdiv(n, 2) * l_pad >= 256:
        bt = _cdiv(n, 2)                                 # give both TCs work
    while bt > 1 and _block_bytes(bt) > (8 << 20):
        bt = _cdiv(bt, 2)

    num_blocks = _cdiv(n, bt)
    n_padded = num_blocks * bt
    if n_padded > n:
        x_p = jnp.pad(x_p, ((0, n_padded - n), (0, 0), (0, 0)))

    w_out = _round_up(bt * l_pad, 128)        # output lanes (unmasked stores)
    w_in = _round_up(w_out + k - 1, 128)      # input lanes incl. tap overhang

    # ---- lane-dense input layout: (num_blocks, C_in, bt*L_pad) -> pad to W_in
    x_b = x_p.reshape(num_blocks, bt, c_in, l_pad).transpose(0, 2, 1, 3)
    x_b = x_b.reshape(num_blocks, c_in, bt * l_pad)
    x_b = jnp.pad(x_b, ((0, 0), (0, 0), (0, w_in - bt * l_pad)))

    # ---- mask applied ONCE here (grid-invariant); tap-major weights + bias col
    wm = (weight * mask).transpose(2, 0, 1)              # (K, C_out, C_in)
    if bias is None:
        b_col = jnp.zeros((c_out, 1), jnp.float32)
    else:
        b_col = bias.reshape(c_out, 1).astype(jnp.float32)

    if compute_dtype is not None:
        x_b = x_b.astype(compute_dtype)
        wm = wm.astype(compute_dtype)

    kernel = functools.partial(_bodypart_conv_kernel, kernel_size=k,
                               w_out=w_out)

    # NOTE: the weight / bias BlockSpecs have constant index maps; at real
    # sizes they could additionally use pipeline_mode=pl.Buffered(1) to drop
    # one buffer each (negligible here, skipped).
    out_blocks = pl.pallas_call(
        kernel,
        out_shape=jax.ShapeDtypeStruct((num_blocks, c_out, w_out), x.dtype),
        grid=(num_blocks,),
        in_specs=[
            pl.BlockSpec((1, c_in, w_in), lambda b: (b, 0, 0)),
            pl.BlockSpec((k, c_out, c_in), lambda b: (0, 0, 0)),
            pl.BlockSpec((c_out, 1), lambda b: (0, 0)),
        ],
        out_specs=pl.BlockSpec((1, c_out, w_out), lambda b: (b, 0, 0)),
        compiler_params=pltpu.CompilerParams(
            dimension_semantics=("parallel",)),
    )(x_b, wm, b_col)

    # (num_blocks, C_out, W_out) -> (N, C_out, L_out)   (layout plumbing only)
    out = out_blocks[:, :, :bt * l_pad].reshape(num_blocks, c_out, bt, l_pad)
    out = out[:, :, :, :(l_out - 1) * stride + 1:stride]
    out = out.transpose(0, 2, 1, 3).reshape(n_padded, c_out, l_out)
    return out[:n]


# ----------------------------------------------------------------------------
# Pure-JAX reference (for correctness check)
# ----------------------------------------------------------------------------
def bodypart_conv_ref(x, weight, mask, bias, *, stride=1, padding=0,
                      padding_mode="constant"):
    mode = _PAD_MODE.get(padding_mode, padding_mode)
    if padding > 0:
        x = jnp.pad(x, ((0, 0), (0, 0), (padding, padding)), mode=mode)
    wm = weight * mask
    out = jax.lax.conv_general_dilated(
        x, wm, window_strides=(stride,), padding="VALID",
        dimension_numbers=("NCH", "OIH", "NCH"))
    if bias is not None:
        out = out + bias.reshape(1, -1, 1)
    return out


if __name__ == "__main__":
    # Small config consistent with the module (first_layer=True path).
    body_lens = 4
    joint_num = 8
    in_channels = 16     # 2 channels per joint
    out_channels = 16    # 4 channels per body part
    kernel_size = 3
    stride = 1
    padding = 1
    batch = 16
    seq = 16

    # Binary joint-membership masks per body part (body_lens x joint_num)
    joint_masks = np.array([
        [1, 1, 1, 0, 0, 0, 0, 0],
        [0, 0, 1, 1, 1, 0, 0, 0],
        [0, 0, 0, 0, 1, 1, 1, 0],
        [0, 0, 0, 0, 0, 1, 1, 1],
    ], dtype=np.int32)

    mask_np = build_mask(body_lens, joint_masks, in_channels, out_channels,
                         kernel_size, joint_num, first_layer=True,
                         last_layer=False)
    mask = jnp.asarray(mask_np)

    # Deterministic parameter init (kaiming_uniform_ with a=sqrt(5) and the
    # matching uniform bias init, as in reset_parameters()).
    key = jax.random.PRNGKey(0)
    kw, kb, kx = jax.random.split(key, 3)
    fan_in = in_channels * kernel_size
    w_bound = 1.0 / math.sqrt(fan_in)          # sqrt(6/((1+5)*fan_in))
    weight = jax.random.uniform(kw, (out_channels, in_channels, kernel_size),
                                jnp.float32, -w_bound, w_bound)
    b_bound = 1.0 / math.sqrt(fan_in)
    bias = jax.random.uniform(kb, (out_channels,), jnp.float32,
                              -b_bound, b_bound)

    x = jax.random.normal(kx, (batch, in_channels, seq), jnp.float32)

    out = bodypart_conv(x, weight, mask, bias, stride=stride, padding=padding,
                        padding_mode="constant")
    out = jax.block_until_ready(out)

    ref = bodypart_conv_ref(x, weight, mask, bias, stride=stride,
                            padding=padding, padding_mode="constant")
    ref = jax.block_until_ready(ref)

    assert out.shape == ref.shape, (out.shape, ref.shape)
    assert jnp.allclose(out, ref, atol=1e-4, rtol=1e-4), float(
        jnp.max(jnp.abs(out - ref)))

    print("KERNEL_OK")
</pallas_src>

<mosaic_0001>
module attributes {stable_mosaic.version = 11 : i64} {
  func.func @_bodypart_conv_kernel(%arg0: i32, %arg1: memref<1x16x512xf32, #tpu.memory_space<vmem>>, %arg2: memref<3x16x16xf32, #tpu.memory_space<vmem>>, %arg3: memref<16x1xf32, #tpu.memory_space<vmem>>, %arg4: memref<1x16x384xf32, #tpu.memory_space<vmem>>) attributes {dimension_semantics = [#tpu.dimension_semantics<parallel>], iteration_bounds = array<i64: 1>, scalar_prefetch = 0 : i64, scratch_operands = 0 : i64, tpu.core_type = #tpu.core_type<tc>, window_params = [{transform_indices = @transform_0, window_bounds = array<i64: 1, 16, 512>}, {pipeline_mode = #tpu.pipeline_mode<synchronous>, transform_indices = @transform_1, window_bounds = array<i64: 3, 16, 16>}, {pipeline_mode = #tpu.pipeline_mode<synchronous>, transform_indices = @transform_2, window_bounds = array<i64: 16, 1>}, {transform_indices = @transform_3, window_bounds = array<i64: 1, 16, 384>}]} {
    %c0 = arith.constant 0 : index
    %c0_0 = arith.constant 0 : index
    %c0_1 = arith.constant 0 : index
    %0 = vector.load %arg2[%c0, %c0_0, %c0_1] : memref<3x16x16xf32, #tpu.memory_space<vmem>>, vector<1x16x16xf32>
    %1 = vector.shape_cast %0 : vector<1x16x16xf32> to vector<16x16xf32>
    %c0_2 = arith.constant 0 : index
    %c0_3 = arith.constant 0 : index
    %c0_4 = arith.constant 0 : index
    %2 = vector.load %arg1[%c0_2, %c0_3, %c0_4] : memref<1x16x512xf32, #tpu.memory_space<vmem>>, vector<1x16x384xf32>
    %3 = vector.shape_cast %2 : vector<1x16x384xf32> to vector<16x384xf32>
    %cst = arith.constant dense<0.000000e+00> : vector<16x384xf32>
    %4 = tpu.matmul %1, %3, %cst {dimension_numbers = #tpu.dot_dimension_numbers<[1], [0], [0], [1], [0, 0, 1, 1], [], []>} : vector<16x16xf32>, vector<16x384xf32>, vector<16x384xf32> -> vector<16x384xf32>
    %c1 = arith.constant 1 : index
    %c0_5 = arith.constant 0 : index
    %c0_6 = arith.constant 0 : index
    %5 = vector.load %arg2[%c1, %c0_5, %c0_6] : memref<3x16x16xf32, #tpu.memory_space<vmem>>, vector<1x16x16xf32>
    %6 = vector.shape_cast %5 : vector<1x16x16xf32> to vector<16x16xf32>
    %c0_7 = arith.constant 0 : index
    %c0_8 = arith.constant 0 : index
    %c1_9 = arith.constant 1 : index
    %7 = vector.load %arg1[%c0_7, %c0_8, %c1_9] : memref<1x16x512xf32, #tpu.memory_space<vmem>>, vector<1x16x384xf32>
    %8 = vector.shape_cast %7 : vector<1x16x384xf32> to vector<16x384xf32>
    %cst_10 = arith.constant dense<0.000000e+00> : vector<16x384xf32>
    %9 = tpu.matmul %6, %8, %cst_10 {dimension_numbers = #tpu.dot_dimension_numbers<[1], [0], [0], [1], [0, 0, 1, 1], [], []>} : vector<16x16xf32>, vector<16x384xf32>, vector<16x384xf32> -> vector<16x384xf32>
    %10 = arith.addf %4, %9 : vector<16x384xf32>
    %c2 = arith.constant 2 : index
    %c0_11 = arith.constant 0 : index
    %c0_12 = arith.constant 0 : index
    %11 = vector.load %arg2[%c2, %c0_11, %c0_12] : memref<3x16x16xf32, #tpu.memory_space<vmem>>, vector<1x16x16xf32>
    %12 = vector.shape_cast %11 : vector<1x16x16xf32> to vector<16x16xf32>
    %c0_13 = arith.constant 0 : index
    %c0_14 = arith.constant 0 : index
    %c2_15 = arith.constant 2 : index
    %13 = vector.load %arg1[%c0_13, %c0_14, %c2_15] : memref<1x16x512xf32, #tpu.memory_space<vmem>>, vector<1x16x384xf32>
    %14 = vector.shape_cast %13 : vector<1x16x384xf32> to vector<16x384xf32>
    %cst_16 = arith.constant dense<0.000000e+00> : vector<16x384xf32>
    %15 = tpu.matmul %12, %14, %cst_16 {dimension_numbers = #tpu.dot_dimension_numbers<[1], [0], [0], [1], [0, 0, 1, 1], [], []>} : vector<16x16xf32>, vector<16x384xf32>, vector<16x384xf32> -> vector<16x384xf32>
    %16 = arith.addf %10, %15 : vector<16x384xf32>
    %c0_17 = arith.constant 0 : index
    %c0_18 = arith.constant 0 : index
    %17 = vector.load %arg3[%c0_17, %c0_18] : memref<16x1xf32, #tpu.memory_space<vmem>>, vector<16x1xf32>
    %18 = vector.broadcast %17 : vector<16x1xf32> to vector<16x384xf32>
    %19 = arith.addf %16, %18 : vector<16x384xf32>
    %c0_19 = arith.constant 0 : index
    %c0_20 = arith.constant 0 : index
    %c0_21 = arith.constant 0 : index
    %20 = vector.load %arg4[%c0_19, %c0_20, %c0_21] : memref<1x16x384xf32, #tpu.memory_space<vmem>>, vector<1x16x384xf32>
    %21 = vector.shape_cast %20 : vector<1x16x384xf32> to vector<16x384xf32>
    %22 = vector.shape_cast %19 : vector<16x384xf32> to vector<1x16x384xf32>
    tpu.vector_store %arg4[%c0_19, %c0_20, %c0_21], %22 {strides = array<i32>} : memref<1x16x384xf32, #tpu.memory_space<vmem>>, vector<1x16x384xf32>,
    return
  }
  func.func @transform_0(%arg0: i32) -> (i32, i32, i32) {
    %c0_i32 = arith.constant 0 : i32
    %c0_i32_0 = arith.constant 0 : i32
    %c0_i32_1 = arith.constant 0 : i32
    return %arg0, %c0_i32, %c0_i32_0 : i32, i32, i32
  }
  func.func @transform_1(%arg0: i32) -> (i32, i32, i32) {
    %c0_i32 = arith.constant 0 : i32
    %c0_i32_0 = arith.constant 0 : i32
    %c0_i32_1 = arith.constant 0 : i32
    %c0_i32_2 = arith.constant 0 : i32
    return %c0_i32, %c0_i32_0, %c0_i32_1 : i32, i32, i32
  }
  func.func @transform_2(%arg0: i32) -> (i32, i32) {
    %c0_i32 = arith.constant 0 : i32
    %c0_i32_0 = arith.constant 0 : i32
    %c0_i32_1 = arith.constant 0 : i32
    return %c0_i32, %c0_i32_0 : i32, i32
  }
  func.func @transform_3(%arg0: i32) -> (i32, i32, i32) {
    %c0_i32 = arith.constant 0 : i32
    %c0_i32_0 = arith.constant 0 : i32
    %c0_i32_1 = arith.constant 0 : i32
    return %arg0, %c0_i32, %c0_i32_0 : i32, i32, i32
  }
}

</mosaic_0001>

<bundles_post_ra>
// kernel: tpu_custom_call.1
= control target key start
LH: loop header
LB: loop body
LE: loop exit
PB: predicated region body
PF: predicated region fallthrough
CT: control target
= control target key end

     0   :  { %8 = vsyncpa [#allocation3], 0  ;;  %s878_s0 = inlined_call_operand.hbm [shape: f32[1,16,512], index: 0, kind: input, shape index: {}]   ;;  %s879_s1 = inlined_call_operand.hbm [shape: f32[3,16,16], index: 1, kind: input, shape index: {}]   ;;  %s880_s2 = inlined_call_operand.vmem [shape: f32[16,1], index: 2, kind: input, shape index: {}]   ;;  %s881_s3 = inlined_call_operand.hbm [shape: f32[1,16,384], index: 3, kind: output, shape index: {}]  }
   0x1   :  { %9 = vsyncpa [#allocation6], 0 }
   0x2   :  { %10 = vsyncpa [#allocation4], 0  ;;  %s780_s12 = smov [#allocation2]  }
   0x3   :  { %s16_s13 = sshll.u32 %s780_s12, 4  ;;  %s17_s13 = int_to_ptr.vmem [resolvable:$true] %s16_s13 }
   0x4   :  { %s722_s14 = scalar_lea.vmem %s17_s13, 1024  ;;  %p727_p1 = scmp.lt.s32.totalorder %s17_s13, %s17_s13 }
   0x5   :  { %p723_p0 = scmp.ne.s32.totalorder %s17_s13, %s722_s14  ;;  %p728_p2 = scmp.lt.s32.totalorder %s722_s14, %s722_s14 }
   0x7   :  { %p729_p3 = por %p728_p2, %p727_p1 }
   0x9   :  { %p730_p4 = pnand %p729_p3, %p723_p0 }
   0xb   :  { %733 = shalt.err (!%p730_p4)
}
   0xc   :  { %s781_s15 = smov 512   ;;  %s782_s16 = smov 32  }
   0xd   :  { %22 = dma.hbm_to_vmem [thread:$0]  %s878_s0, 1024, %s17_s13, [#allocation3], %s781_s15, %s781_s15, %s782_s16  }
   0xe   :  { %s783_s19 = smov [#allocation5]  }
   0xf   :  { %s28_s20 = sshll.u32 %s783_s19, 4  ;;  %s29_s20 = int_to_ptr.vmem [resolvable:$true] %s28_s20 }
  0x10   :  { %s742_s21 = scalar_lea.vmem %s29_s20, 768  ;;  %p747_p6 = scmp.lt.s32.totalorder %s29_s20, %s29_s20 }
  0x11   :  { %p743_p5 = scmp.ne.s32.totalorder %s29_s20, %s742_s21  ;;  %p748_p7 = scmp.lt.s32.totalorder %s742_s21, %s742_s21 }
  0x13   :  { %p749_p8 = por %p748_p7, %p747_p6 }
  0x15   :  { %p750_p9 = pnand %p749_p8, %p743_p5 }
  0x17   :  { %753 = shalt.err (!%p750_p9)
}
  0x18   :  { %s784_s22 = smov 128   ;;  %s785_s23 = smov 8  }
  0x19   :  { %34 = dma.hbm_to_vmem [thread:$0]  %s879_s1, 768, %s29_s20, [#allocation6], %s784_s22, %s784_s22, %s785_s23  }
  0x1a   :  { %774 = dma.done.wait [#allocation3], 1024  }
  0x1b   :  { %775 = vsyncadd [#allocation3], 4294966272 }
  0x1c   :  { %776 = dma.done.wait [#allocation6], 768  }
  0x1d   :  { %777 = vsyncadd [#allocation6], 4294966528  ;;  %v786_v0 = vmov 0.0   ;;  %v820_v1 = vld [vmem:[#allocation2 + $0x28] sm:$0xff]  ;;  %v822_v2 = vld [vmem:[#allocation2 + $0x20] sm:$0xff]  ;;  %s787_s0 = smov 127  }
  0x1e   :  { %170 = vmatprep.mubr.f32.mxu0 %v786_v0  ;;  %80 = vrot.lane.b32.xlu0 %v820_v1, %s787_s0  ;;  %v60_v3 = vld [vmem:[#allocation2 + $0x30] sm:$0xff]  ;;  %v826_v4 = vld [vmem:[#allocation2 + $0x8] sm:$0xff]  ;;  %vm99_vm0 = vcmask 130048   ;;  %v830_v7 = vld [vmem:[#allocation2] sm:$0xff]  ;;  %s788_s1 = smov 126   ;;  %v789_v10 = vmov 0  }
  0x1f   :  { %78 = vrot.lane.b32.xlu1 %v822_v2, %s787_s0  ;;  %v52_v5 = vld [vmem:[#allocation5 + $0x10] sm:$0xff]  ;;  %v61_v8 = vld [vmem:[#allocation2 + $0x38] sm:$0xff]  ;;  %712 = vset.pattern.permute.xlu0 %v789_v10  ;;  %v612_v11 = vld [vmem:[%s880_s2] sm:$0xff]  ;;  %vm86_vm1 = vcmask 1039360   ;;  %vm435_vm2 = vcmask 1031168  }
  0x20   :  { %682 = vmatprep.mubr.msk.f32.mxu1 %vm99_vm0, %v52_v5  ;;  %v56_v6 = vld [vmem:[#allocation2 + $0x10] sm:$0xff]  ;;  %v57_v9 = vld [vmem:[#allocation2 + $0x18] sm:$0xff]  ;;  %713 = vset.pattern.permute.xlu1 %v789_v10  ;;  %v613_v12 = vld [vmem:[%s880_s2 + $0x8] sm:$0xff]  ;;  %s790_s2 = smov [#allocation7]  }
  0x21   :  { %v53_v26 = vld [vmem:[#allocation5 + $0x18] sm:$0xff]  ;;  %v43_v27 = vld [vmem:[#allocation5] sm:$0xff]  ;;  %v44_v32 = vld [vmem:[#allocation5 + $0x8] sm:$0xff]  ;;  %s641_s30 = sshll.u32 %s790_s2, 4  ;;  %s642_s30 = int_to_ptr.vmem [resolvable:$true] %s641_s30 }
  0x22   :  { %82 = vrot.lane.b32.xlu0 %v60_v3, %s787_s0  ;;  %v417_v40 = vld [vmem:[#allocation5 + $0x20] sm:$0xff]  ;;  %v418_v44 = vld [vmem:[#allocation5 + $0x28] sm:$0xff]  ;;  %s754_s4 = scalar_lea.vmem %s642_s30, 768  ;;  %p759_p11 = scmp.lt.s32.totalorder %s642_s30, %s642_s30 }
  0x23   :  { %72 = vrot.lane.b32.xlu1 %v826_v4, %s787_s0  ;;  %p755_p10 = scmp.ne.s32.totalorder %s642_s30, %s754_s4  ;;  %p760_p12 = scmp.lt.s32.totalorder %s754_s4, %s754_s4 }
  0x25   :  { %p761_p13 = por %p760_p12, %p759_p11 }
  0x26   :  { %74 = vrot.lane.b32.xlu0 %v56_v6, %s787_s0 }
  0x27   :  { %70 = vrot.lane.b32.xlu1 %v830_v7, %s787_s0  ;;  %p762_p0 = pnand %p761_p13, %p755_p10 }
  0x2a   :  { %84 = vrot.lane.b32.xlu0 %v61_v8, %s787_s0 }
  0x2b   :  { %76 = vrot.lane.b32.xlu1 %v57_v9, %s787_s0 }
  0x2e   :  { %429 = vrot.lane.b32.xlu0 %v820_v1, %s788_s1 }
  0x2f   :  { %431 = vrot.lane.b32.xlu1 %v60_v3, %s788_s1 }
  0x32   :  { %427 = vrot.lane.b32.xlu0 %v822_v2, %s788_s1 }
  0x33   :  { %421 = vrot.lane.b32.xlu1 %v826_v4, %s788_s1 }
  0x36   :  { %423 = vrot.lane.b32.xlu0 %v56_v6, %s788_s1 }
  0x37   :  { %419 = vrot.lane.b32.xlu1 %v830_v7, %s788_s1 }
  0x3a   :  { %433 = vrot.lane.b32.xlu0 %v61_v8, %s788_s1 }
  0x3b   :  { %425 = vrot.lane.b32.xlu1 %v57_v9, %s788_s1 }
  0x3e   :  { %616 = vperm.xlu0 %712, %v612_v11  }
  0x3f   :  { %621 = vperm.xlu1 %713, %v613_v12  }
  0x90   :  { %v81_v13 = vpop.permute.xlu0 %80 }
  0x91   :  { %v79_v14 = vpop.permute.xlu1 %78 }
  0x92   :  { %v90_v18 = vsel %vm86_vm1, %v79_v14, %v81_v13 }
  0x94   :  { %v83_v15 = vpop.permute.xlu0 %82 }
  0x95   :  { %v73_v16 = vpop.permute.xlu1 %72  ;;  %v91_v17 = vsel %vm86_vm1, %v81_v13, %v83_v15 }
  0x96   :  { %134 = vmatprep.subr.mxu0 %v91_v17 }
  0x97   :  { %135 = vmatpush1.msra.mxu0 %v90_v18 }
  0x98   :  { %v75_v19 = vpop.permute.xlu0 %74 }
  0x99   :  { %v71_v20 = vpop.permute.xlu1 %70  ;;  %v88_v21 = vsel %vm86_vm1, %v73_v16, %v75_v19 }
  0x9a   :  { %v87_v22 = vsel %vm86_vm1, %v71_v20, %v73_v16  ;;  %136 = vmatprep.subr.mxu0 %v88_v21 }
  0x9b   :  { %137 = vmatpush1.msra.mxu0 %v87_v22 }
  0x9c   :  { %v85_v23 = vpop.permute.xlu0 %84  ;;  %654 = vmatmul.mubr.msk.f32.vlgmr.msra.gmra.mxu0 %vm99_vm0, %v52_v5  ;;  %685 = vmatprep.subr.mxu0 %v60_v3 }
  0x9d   :  { %v77_v24 = vpop.permute.xlu1 %76  ;;  %v92_v25 = vsel %vm86_vm1, %v83_v15, %v85_v23  ;;  %686 = vmatpush3.msra.mxu0 %v60_v3  ;;  %176 = vmatprep.mubr.f32.mxu0 %v786_v0 }
  0x9e   :  { %678 = vmatprep.subr.mxu1 %v92_v25  ;;  %687 = vmatprep.subr.mxu0 %v56_v6  ;;  %v89_v28 = vsel %vm86_vm1, %v75_v19, %v77_v24 }
  0x9f   :  { %679 = vmatpush3.msra.mxu1 %v92_v25  ;;  %688 = vmatpush3.msra.mxu0 %v56_v6 }
  0xa0   :  { %v430_v29 = vpop.permute.xlu0 %429  ;;  %680 = vmatprep.subr.mxu1 %v89_v28  ;;  %655 = vmatmul.mubr.msk.f32.gmra.mxu0 %vm99_vm0, %v53_v26 }
  0xa1   :  { %v432_v30 = vpop.permute.xlu1 %431  ;;  %681 = vmatpush3.msra.mxu1 %v89_v28  ;;  %689 = vmatprep.mubr.msk.f32.mxu0 %vm99_vm0, %v43_v27 }
  0xa2   :  { %v440_v31 = vsel %vm435_vm2, %v430_v29, %v432_v30  ;;  %683 = vmatmul.mubr.msk.f32.vlgmr.msra.gmra.mxu1 %vm99_vm0, %v53_v26  ;;  %292 = vmatprep.subr.mxu1 %v820_v1 }
  0xa3   :  { %482 = vmatprep.subr.mxu0 %v440_v31  ;;  %293 = vmatpush1.msra.mxu1 %v822_v2 }
  0xa4   :  { %v428_v33 = vpop.permute.xlu0 %427  ;;  %294 = vmatprep.subr.mxu1 %v826_v4  ;;  %328 = vmatprep.mubr.f32.mxu1 %v786_v0 }
  0xa5   :  { %v422_v34 = vpop.permute.xlu1 %421  ;;  %v439_v35 = vsel %vm435_vm2, %v428_v33, %v430_v29  ;;  %295 = vmatpush1.msra.mxu1 %v830_v7  ;;  %690 = vmatmul.mubr.msk.f32.vlgmr.msra.gmra.mxu0 %vm99_vm0, %v44_v32 }
  0xa6   :  { %658 = vmatmul.mubr.msk.f32.vlgmr.msra.gmra.mxu1 %vm99_vm0, %v43_v27  ;;  %483 = vmatpush1.msra.mxu0 %v439_v35 }
  0xa7   :  { %334 = vmatprep.mubr.f32.mxu1 %v786_v0  ;;  %518 = vmatprep.mubr.f32.mxu0 %v786_v0 }
  0xa8   :  { %v424_v36 = vpop.permute.xlu0 %423 }
  0xa9   :  { %v420_v37 = vpop.permute.xlu1 %419  ;;  %v437_v39 = vsel %vm435_vm2, %v422_v34, %v424_v36 }
  0xaa   :  { %v436_v38 = vsel %vm435_vm2, %v420_v37, %v422_v34  ;;  %659 = vmatmul.mubr.msk.f32.gmra.mxu1 %vm99_vm0, %v44_v32  ;;  %484 = vmatprep.subr.mxu0 %v437_v39 }
  0xab   :  { %485 = vmatpush1.msra.mxu0 %v436_v38  ;;  %696 = vmatprep.mubr.msk.f32.mxu1 %vm99_vm0, %v417_v40 }
  0xac   :  { %v434_v41 = vpop.permute.xlu0 %433  ;;  %662 = vmatmul.mubr.msk.f32.vlgmr.msra.gmra.mxu0 %vm99_vm0, %v417_v40 }
  0xad   :  { %v426_v42 = vpop.permute.xlu1 %425  ;;  %v441_v43 = vsel %vm435_vm2, %v432_v30, %v434_v41  ;;  %524 = vmatprep.mubr.f32.mxu0 %v786_v0 }
  0xae   :  { %692 = vmatprep.subr.mxu1 %v441_v43  ;;  %v438_v45 = vsel %vm435_vm2, %v424_v36, %v426_v42 }
  0xaf   :  { %693 = vmatpush3.msra.mxu1 %v441_v43 }
  0xb0   :  { %663 = vmatmul.mubr.msk.f32.gmra.mxu0 %vm99_vm0, %v418_v44  ;;  %694 = vmatprep.subr.mxu1 %v438_v45 }
  0xb1   :  { %695 = vmatpush3.msra.mxu1 %v438_v45 }
  0xb2   :  { %697 = vmatmul.mubr.msk.f32.vlgmr.msra.gmra.mxu1 %vm99_vm0, %v418_v44 }
  0xb9   :  { %v617_v59 = vpop.permute.xlu0 %616 }
  0xba   :  { %v622_v4 = vpop.permute.xlu1 %621 }
 0x15c   :  { %v172_v46 = vpop.f32.mrf.mxu0 }
 0x15e   :  { %v174_v47 = vpop.f32.mrf.mxu0 }
 0x160   :  { %v178_v48 = vpop.f32.mrf.mxu0 }
 0x162   :  { %v684_v49 = vpop.f32.mrf.mxu1  ;;  %v180_v50 = vpop.f32.mrf.mxu0 }
 0x164   :  { %v249_v51 = vpop.f32.mrf.mxu1 }
 0x165   :  { %v691_v53 = vpop.f32.mrf.mxu0 }
 0x166   :  { %v330_v52 = vpop.f32.mrf.mxu1  ;;  %v413_v5 = vadd.f32 %v691_v53, %v684_v49 }
 0x167   :  { %v407_v56 = vpop.f32.mrf.mxu0  ;;  %v331_v57 = vadd.f32 %v330_v52, %v172_v46 }
 0x168   :  { %v332_v54 = vpop.f32.mrf.mxu1  ;;  %v408_v11 = vadd.f32 %v407_v56, %v249_v51 }
 0x169   :  { %v333_v60 = vadd.f32 %v332_v54, %v174_v47 }
 0x16a   :  { %v336_v55 = vpop.f32.mrf.mxu1 }
 0x16b   :  { %v337_v0 = vadd.f32 %v336_v55, %v178_v48 }
 0x16c   :  { %v520_v58 = vpop.f32.mrf.mxu0  ;;  %v338_v62 = vpop.f32.mrf.mxu1 }
 0x16d   :  { %v606_v61 = vadd.f32 %v520_v58, %v331_v57  ;;  %v339_v6 = vadd.f32 %v338_v62, %v180_v50 }
 0x16e   :  { %v522_v63 = vpop.f32.mrf.mxu0 }
 0x16f   :  { %v624_v1 = vadd.f32 %v617_v59, %v606_v61  ;;  %v607_v2 = vadd.f32 %v522_v63, %v333_v60 }
 0x170   :  { %v526_v3 = vpop.f32.mrf.mxu0 }
 0x171   :  { %630 = vst [vmem:[#allocation7] sm:$0xff] %v624_v1  ;;  %v625_v7 = vadd.f32 %v617_v59, %v607_v2  ;;  %v609_v8 = vadd.f32 %v526_v3, %v337_v0 }
 0x172   :  { %v528_v9 = vpop.f32.mrf.mxu0  ;;  %v698_v10 = vpop.f32.mrf.mxu1 }
 0x173   :  { %631 = vst [vmem:[#allocation7 + $0x8] sm:$0xff] %v625_v7  ;;  %v627_v12 = vadd.f32 %v622_v4, %v609_v8  ;;  %v610_v13 = vadd.f32 %v528_v9, %v339_v6  ;;  %v611_v14 = vadd.f32 %v698_v10, %v413_v5 }
 0x174   :  { %v597_v15 = vpop.f32.mrf.mxu1 }
 0x175   :  { %633 = vst [vmem:[#allocation7 + $0x18] sm:$0xff] %v627_v12  ;;  %v628_v16 = vadd.f32 %v622_v4, %v610_v13  ;;  %v629_v17 = vadd.f32 %v622_v4, %v611_v14  ;;  %v608_v18 = vadd.f32 %v597_v15, %v408_v11 }
 0x177   :  { %634 = vst [vmem:[#allocation7 + $0x20] sm:$0xff] %v628_v16  ;;  %635 = vst [vmem:[#allocation7 + $0x28] sm:$0xff] %v629_v17  ;;  %v626_v19 = vadd.f32 %v617_v59, %v608_v18 }
 0x179   :  { %632 = vst [vmem:[#allocation7 + $0x10] sm:$0xff] %v626_v19 }
 0x17a   :  { %765 = shalt.err (!%p762_p0)
}
 0x17b   :  { %s791_s5 = smov 384   ;;  %s792_s6 = smov 24  }
 0x17c   :  { %647 = dma.vmem_to_hbm [thread:$0]  %s642_s30, 768, %s881_s3, [#allocation4], %s791_s5, %s791_s5, %s792_s6  }
 0x17d   :  { %778 = dma.done.wait [#allocation4], 768  }
 0x17e   :  { %779 = vsyncadd [#allocation4], 4294966528 }
 0x17f   :  { %651 = vsyncpa [#allocation3], 1 }
 0x180   :  { %652 = vsyncpa [#allocation6], 1 }
 0x181   :  { %653 = vsyncpa [#allocation4], 1 }

</bundles_post_ra>
